<compile_context>
chip_gen: v6e
topology: v6e:2x2x1
jax: 0.10.0
libtpu: 0.0.40
codegen_flags: <defaults>
</compile_context>

<pallas_src>
import functools

import jax
import jax.numpy as jnp
from jax import lax
from jax.experimental import pallas as pl
from jax.experimental.pallas import tpu as pltpu


def _round_up(x, m):
    return (x + m - 1) // m * m


def ensemble_kernel(x_ref, w_ref, b_ref, o_ref, *, n_models):
    # x_ref: (TB, Dp) bf16, w_ref: (M, Dp, TC) bf16, b_ref: (M, TC) f32,
    # o_ref: (TB, TC) f32.  All members handled inside this one invocation.
    x = x_ref[...]

    def body(m, acc):
        return acc + jnp.dot(x, w_ref[m], preferred_element_type=jnp.float32)

    acc = lax.fori_loop(
        0, n_models, body,
        jnp.zeros(o_ref.shape, jnp.float32),
        unroll=True,  # short static trip count -> full LLO visibility
    )
    # Bias added once (summed over members); mean via constant multiply.
    acc = acc + jnp.sum(b_ref[...], axis=0, keepdims=True)
    o_ref[...] = (acc * (1.0 / n_models)).astype(o_ref.dtype)


def ensemble_forward(x, w, b, *, tile_b=128, tile_c=128):
    """x: [B, D], w: [M, D, C], b: [M, C] -> [B, C] = mean_m(x @ w[m] + b[m])."""
    B, D = x.shape
    M, _, C = w.shape

    # Pad to MXU / lane-dense shapes (layout plumbing only).
    Bp = _round_up(B, 8)
    tile_b = min(tile_b, Bp)
    Bp = _round_up(Bp, tile_b)
    Dp = _round_up(D, 128)
    Cp = _round_up(C, tile_c)

    x_p = jnp.zeros((Bp, Dp), jnp.bfloat16).at[:B, :D].set(x.astype(jnp.bfloat16))
    w_p = jnp.zeros((M, Dp, Cp), jnp.bfloat16).at[:, :D, :C].set(w.astype(jnp.bfloat16))
    b_p = jnp.zeros((M, Cp), jnp.float32).at[:, :C].set(b.astype(jnp.float32))

    grid = (Bp // tile_b, Cp // tile_c)

    out_p = pl.pallas_call(
        functools.partial(ensemble_kernel, n_models=M),
        out_shape=jax.ShapeDtypeStruct((Bp, Cp), jnp.float32),
        grid_spec=pltpu.PrefetchScalarGridSpec(
            num_scalar_prefetch=0,
            grid=grid,
            in_specs=[
                pl.BlockSpec((tile_b, Dp), lambda i, j: (i, 0)),
                pl.BlockSpec((M, Dp, tile_c), lambda i, j: (0, 0, j)),
                pl.BlockSpec((M, tile_c), lambda i, j: (0, j)),
            ],
            out_specs=pl.BlockSpec((tile_b, tile_c), lambda i, j: (i, j)),
        ),
        compiler_params=pltpu.CompilerParams(
            # Both axes independent -> v7x's two TensorCores can split them.
            dimension_semantics=("parallel", "parallel"),
            # Re-derive tile sizes / this limit for v7x's 64 MiB physical VMEM
            # when scaling D/C up; at these blocks it is ample headroom.
            vmem_limit_bytes=32 * 1024 * 1024,
        ),
    )(x_p, w_p, b_p)

    return out_p[:B, :C].astype(x.dtype)


if __name__ == "__main__":
    # Small, deterministic synthetic setup.
    B, D, C, M = 8, 32, 16, 4  # batch, features, classes, ensemble size

    key = jax.random.PRNGKey(0)
    kx, kw, kb = jax.random.split(key, 3)
    x = jax.random.normal(kx, (B, D), dtype=jnp.float32)
    w = jax.random.normal(kw, (M, D, C), dtype=jnp.float32) * 0.1
    b = jax.random.normal(kb, (M, C), dtype=jnp.float32) * 0.1

    out = jax.block_until_ready(ensemble_forward(x, w, b))

    # Pure-JAX reference using the same bf16 operand precision the MXU sees.
    x_bf = x.astype(jnp.bfloat16).astype(jnp.float32)
    w_bf = w.astype(jnp.bfloat16).astype(jnp.float32)
    ref = jnp.mean(jnp.einsum("bd,mdc->mbc", x_bf, w_bf) + b[:, None, :], axis=0)

    assert out.shape == (B, C)
    assert jnp.allclose(out, ref, atol=1e-4, rtol=1e-4), "mismatch vs reference"

    print("KERNEL_OK")
</pallas_src>

<mosaic_0001>
module attributes {stable_mosaic.version = 11 : i64} {
  func.func @ensemble_kernel(%arg0: i32, %arg1: i32, %arg2: memref<8x128xbf16, #tpu.memory_space<vmem>>, %arg3: memref<4x128x128xbf16, #tpu.memory_space<vmem>>, %arg4: memref<4x128xf32, #tpu.memory_space<vmem>>, %arg5: memref<8x128xf32, #tpu.memory_space<vmem>>) attributes {dimension_semantics = [#tpu.dimension_semantics<parallel>, #tpu.dimension_semantics<parallel>], iteration_bounds = array<i64: 1, 1>, scalar_prefetch = 0 : i64, scratch_operands = 0 : i64, tpu.core_type = #tpu.core_type<tc>, window_params = [{transform_indices = @transform_0, window_bounds = array<i64: 8, 128>}, {transform_indices = @transform_1, window_bounds = array<i64: 4, 128, 128>}, {transform_indices = @transform_2, window_bounds = array<i64: 4, 128>}, {transform_indices = @transform_3, window_bounds = array<i64: 8, 128>}]} {
    %c0 = arith.constant 0 : index
    %c0_0 = arith.constant 0 : index
    %0 = vector.load %arg2[%c0, %c0_0] : memref<8x128xbf16, #tpu.memory_space<vmem>>, vector<8x128xbf16>
    %cst = arith.constant 0.000000e+00 : f32
    %1 = vector.broadcast %cst : f32 to vector<8x128xf32>
    %c0_i32 = arith.constant 0 : i32
    %2 = arith.index_cast %c0_i32 : i32 to index
    %c0_1 = arith.constant 0 : index
    %c0_2 = arith.constant 0 : index
    %3 = vector.load %arg3[%2, %c0_1, %c0_2] : memref<4x128x128xbf16, #tpu.memory_space<vmem>>, vector<1x128x128xbf16>
    %4 = vector.shape_cast %3 : vector<1x128x128xbf16> to vector<128x128xbf16>
    %cst_3 = arith.constant dense<0.000000e+00> : vector<8x128xf32>
    %5 = tpu.matmul %0, %4, %cst_3 {dimension_numbers = #tpu.dot_dimension_numbers<[1], [0], [0], [1], [0, 0, 1, 1], [], []>} : vector<8x128xbf16>, vector<128x128xbf16>, vector<8x128xf32> -> vector<8x128xf32>
    %6 = arith.addf %1, %5 : vector<8x128xf32>
    %c1_i32 = arith.constant 1 : i32
    %7 = arith.index_cast %c1_i32 : i32 to index
    %c0_4 = arith.constant 0 : index
    %c0_5 = arith.constant 0 : index
    %8 = vector.load %arg3[%7, %c0_4, %c0_5] : memref<4x128x128xbf16, #tpu.memory_space<vmem>>, vector<1x128x128xbf16>
    %9 = vector.shape_cast %8 : vector<1x128x128xbf16> to vector<128x128xbf16>
    %cst_6 = arith.constant dense<0.000000e+00> : vector<8x128xf32>
    %10 = tpu.matmul %0, %9, %cst_6 {dimension_numbers = #tpu.dot_dimension_numbers<[1], [0], [0], [1], [0, 0, 1, 1], [], []>} : vector<8x128xbf16>, vector<128x128xbf16>, vector<8x128xf32> -> vector<8x128xf32>
    %11 = arith.addf %6, %10 : vector<8x128xf32>
    %c2_i32 = arith.constant 2 : i32
    %12 = arith.index_cast %c2_i32 : i32 to index
    %c0_7 = arith.constant 0 : index
    %c0_8 = arith.constant 0 : index
    %13 = vector.load %arg3[%12, %c0_7, %c0_8] : memref<4x128x128xbf16, #tpu.memory_space<vmem>>, vector<1x128x128xbf16>
    %14 = vector.shape_cast %13 : vector<1x128x128xbf16> to vector<128x128xbf16>
    %cst_9 = arith.constant dense<0.000000e+00> : vector<8x128xf32>
    %15 = tpu.matmul %0, %14, %cst_9 {dimension_numbers = #tpu.dot_dimension_numbers<[1], [0], [0], [1], [0, 0, 1, 1], [], []>} : vector<8x128xbf16>, vector<128x128xbf16>, vector<8x128xf32> -> vector<8x128xf32>
    %16 = arith.addf %11, %15 : vector<8x128xf32>
    %c3_i32 = arith.constant 3 : i32
    %17 = arith.index_cast %c3_i32 : i32 to index
    %c0_10 = arith.constant 0 : index
    %c0_11 = arith.constant 0 : index
    %18 = vector.load %arg3[%17, %c0_10, %c0_11] : memref<4x128x128xbf16, #tpu.memory_space<vmem>>, vector<1x128x128xbf16>
    %19 = vector.shape_cast %18 : vector<1x128x128xbf16> to vector<128x128xbf16>
    %cst_12 = arith.constant dense<0.000000e+00> : vector<8x128xf32>
    %20 = tpu.matmul %0, %19, %cst_12 {dimension_numbers = #tpu.dot_dimension_numbers<[1], [0], [0], [1], [0, 0, 1, 1], [], []>} : vector<8x128xbf16>, vector<128x128xbf16>, vector<8x128xf32> -> vector<8x128xf32>
    %21 = arith.addf %16, %20 : vector<8x128xf32>
    %c4_i32 = arith.constant 4 : i32
    %c0_13 = arith.constant 0 : index
    %c0_14 = arith.constant 0 : index
    %22 = vector.load %arg4[%c0_13, %c0_14] : memref<4x128xf32, #tpu.memory_space<vmem>>, vector<4x128xf32>
    %cst_15 = arith.constant dense<0.000000e+00> : vector<128xf32>
    %23 = vector.multi_reduction <add>, %22, %cst_15 [0] : vector<4x128xf32> to vector<128xf32>
    %24 = vector.shape_cast %23 : vector<128xf32> to vector<1x128xf32>
    %25 = vector.broadcast %24 : vector<1x128xf32> to vector<8x128xf32>
    %26 = arith.addf %21, %25 : vector<8x128xf32>
    %cst_16 = arith.constant 2.500000e-01 : f32
    %27 = vector.broadcast %cst_16 : f32 to vector<8x128xf32>
    %28 = arith.mulf %26, %27 : vector<8x128xf32>
    %c0_17 = arith.constant 0 : index
    %c0_18 = arith.constant 0 : index
    %29 = vector.load %arg5[%c0_17, %c0_18] : memref<8x128xf32, #tpu.memory_space<vmem>>, vector<8x128xf32>
    tpu.vector_store %arg5[%c0_17, %c0_18], %28 {strides = array<i32>} : memref<8x128xf32, #tpu.memory_space<vmem>>, vector<8x128xf32>,
    return
  }
  func.func @transform_0(%arg0: i32, %arg1: i32) -> (i32, i32) {
    %c0_i32 = arith.constant 0 : i32
    %c0_i32_0 = arith.constant 0 : i32
    return %arg0, %c0_i32 : i32, i32
  }
  func.func @transform_1(%arg0: i32, %arg1: i32) -> (i32, i32, i32) {
    %c0_i32 = arith.constant 0 : i32
    %c0_i32_0 = arith.constant 0 : i32
    %c0_i32_1 = arith.constant 0 : i32
    return %c0_i32, %c0_i32_0, %arg1 : i32, i32, i32
  }
  func.func @transform_2(%arg0: i32, %arg1: i32) -> (i32, i32) {
    %c0_i32 = arith.constant 0 : i32
    %c0_i32_0 = arith.constant 0 : i32
    return %c0_i32, %arg1 : i32, i32
  }
  func.func @transform_3(%arg0: i32, %arg1: i32) -> (i32, i32) {
    %c0_i32 = arith.constant 0 : i32
    return %arg0, %arg1 : i32, i32
  }
}

</mosaic_0001>

<bundles_post_ra>
// kernel: tpu_custom_call.1
= control target key start
LH: loop header
LB: loop body
LE: loop exit
PB: predicated region body
PF: predicated region fallthrough
CT: control target
= control target key end

     0   :  { %8 = vsyncpa [#allocation3], 0  ;;  %s857_s0 = inlined_call_operand.hbm [shape: bf16[8,128], index: 0, kind: input, shape index: {}]   ;;  %s858_s1 = inlined_call_operand.hbm [shape: bf16[4,128,128], index: 1, kind: input, shape index: {}]   ;;  %s859_s2 = inlined_call_operand.hbm [shape: f32[4,128], index: 2, kind: input, shape index: {}]   ;;  %s860_s3 = inlined_call_operand.hbm [shape: f32[8,128], index: 3, kind: output, shape index: {}]  }
   0x1   :  { %9 = vsyncpa [#allocation6], 0 }
   0x2   :  { %10 = vsyncpa [#allocation4], 0  ;;  %s777_s12 = smov [#allocation5]  }
   0x3   :  { %s26_s13 = sshll.u32 %s777_s12, 4  ;;  %s27_s13 = int_to_ptr.vmem [resolvable:$true] %s26_s13 }
   0x4   :  { %s699_s14 = scalar_lea.vmem %s27_s13, 4096  ;;  %p704_p1 = scmp.lt.s32.totalorder %s27_s13, %s27_s13 }
   0x5   :  { %p700_p0 = scmp.ne.s32.totalorder %s27_s13, %s699_s14  ;;  %p705_p2 = scmp.lt.s32.totalorder %s699_s14, %s699_s14 }
   0x7   :  { %p706_p3 = por %p705_p2, %p704_p1 }
   0x9   :  { %p707_p4 = pnand %p706_p3, %p700_p0 }
   0xb   :  { %710 = shalt.err (!%p707_p4)
}
   0xc   :  { %s778_s15 = smov 64   ;;  %s779_s16 = smov 4  }
   0xd   :  { %32 = dma.hbm_to_vmem [thread:$0]  %s858_s1, 4096, %s27_s13, [#allocation6], %s778_s15, %s778_s15, %s779_s16  }
   0xe   :  { %s780_s19 = smov [#allocation2]   ;;  %s781_s21 = smov [#allocation7]  }
   0xf   :  { %s17_s20 = sshll.u32 %s780_s19, 4  ;;  %s39_s22 = sshll.u32 %s781_s21, 4  ;;  %s18_s20 = int_to_ptr.vmem [resolvable:$true] %s17_s20  ;;  %s40_s22 = int_to_ptr.vmem [resolvable:$true] %s39_s22 }
  0x10   :  { %s719_s23 = scalar_lea.vmem %s18_s20, 64  ;;  %p724_p6 = scmp.lt.s32.totalorder %s18_s20, %s18_s20 }
  0x11   :  { %p720_p5 = scmp.ne.s32.totalorder %s18_s20, %s719_s23  ;;  %p725_p7 = scmp.lt.s32.totalorder %s719_s23, %s719_s23 }
  0x13   :  { %p726_p8 = por %p725_p7, %p724_p6 }
  0x15   :  { %p727_p9 = pnand %p726_p8, %p720_p5 }
  0x17   :  { %730 = shalt.err (!%p727_p9)
}
  0x18   :  { %20 = dma.hbm_to_vmem [thread:$0]  %s857_s0, 64, %s18_s20, [#allocation3]  }
  0x19   :  { %s739_s26 = scalar_lea.vmem %s40_s22, 64  ;;  %p744_p11 = scmp.lt.s32.totalorder %s40_s22, %s40_s22 }
  0x1a   :  { %p740_p10 = scmp.ne.s32.totalorder %s40_s22, %s739_s26  ;;  %p745_p12 = scmp.lt.s32.totalorder %s739_s26, %s739_s26 }
  0x1c   :  { %p746_p13 = por %p745_p12, %p744_p11 }
  0x1e   :  { %p747_p0 = pnand %p746_p13, %p740_p10 }
  0x20   :  { %750 = shalt.err (!%p747_p0)
}
  0x21   :  { %42 = dma.hbm_to_vmem [thread:$0]  %s859_s2, 64, %s40_s22, [#allocation6]  }
  0x22   :  { %771 = dma.done.wait [#allocation3], 64  }
  0x23   :  { %772 = vsyncadd [#allocation3], 4294967232 }
  0x24   :  { %773 = dma.done.wait [#allocation6], 4160  }
  0x25   :  { %774 = vsyncadd [#allocation6], 4294963136  ;;  %v782_v0 = vmov 0.0   ;;  %vm783_vm0 = vmmov 0   ;;  %v659_v1 = vld [vmem:[#allocation5 + $0x78] sm:$0xff]   ;;  %v661_v3 = vld [vmem:[#allocation5 + $0x70] sm:$0xff]  }
  0x26   :  { %571 = vmatprep.subr.bf16.mxu0 %v782_v0  ;;  %591 = vmatprep.subr.bf16.mxu1 %v782_v0  ;;  %v660_v2 = vld [vmem:[#allocation5 + $0x38] sm:$0xff]   ;;  %v662_v4 = vld [vmem:[#allocation5 + $0x30] sm:$0xff]   ;;  %v663_v5 = vld [vmem:[#allocation5 + $0x68] sm:$0xff]   ;;  %vm476_vm1 = vcmask 1043456   ;;  %s784_s0 = smov [#allocation8]  }
  0x27   :  { %587 = vmatprep.mubr.msk.bf16.mxu0 %vm783_vm0, %v782_v0  ;;  %607 = vmatprep.mubr.msk.bf16.mxu1 %vm783_vm0, %v782_v0  ;;  %v664_v6 = vld [vmem:[#allocation5 + $0x28] sm:$0xff]   ;;  %v665_v7 = vld [vmem:[#allocation5 + $0x60] sm:$0xff]   ;;  %v667_v9 = vld [vmem:[#allocation5 + $0x58] sm:$0xff]   ;;  %s493_s2 = sshll.u32 %s784_s0, 4  ;;  %s494_s2 = int_to_ptr.vmem [resolvable:$true] %s493_s2 }
  0x28   :  { %572 = vmatpush3.bf16.msra.mxu0 %v659_v1  ;;  %592 = vmatpush3.bf16.msra.mxu1 %v660_v2  ;;  %v666_v8 = vld [vmem:[#allocation5 + $0x20] sm:$0xff]   ;;  %v668_v10 = vld [vmem:[#allocation5 + $0x18] sm:$0xff]   ;;  %v669_v11 = vld [vmem:[#allocation5 + $0x50] sm:$0xff]   ;;  %s751_s28 = scalar_lea.vmem %s494_s2, 128  ;;  %p756_p2 = scmp.lt.s32.totalorder %s494_s2, %s494_s2 }
  0x29   :  { %573 = vmatprep.subr.bf16.mxu0 %v782_v0  ;;  %593 = vmatprep.subr.bf16.mxu1 %v782_v0  ;;  %v670_v12 = vld [vmem:[#allocation5 + $0x10] sm:$0xff]   ;;  %v671_v13 = vld [vmem:[#allocation5 + $0x48] sm:$0xff]   ;;  %v673_v15 = vld [vmem:[#allocation5 + $0x40] sm:$0xff]   ;;  %p752_p1 = scmp.ne.s32.totalorder %s494_s2, %s751_s28  ;;  %p757_p3 = scmp.lt.s32.totalorder %s751_s28, %s751_s28 }
  0x2a   :  { %v672_v14 = vld [vmem:[#allocation5 + $0x8] sm:$0xff]   ;;  %v674_v16 = vld [vmem:[#allocation5] sm:$0xff]   ;;  %v53_v17 = vld [vmem:[#allocation2] sm:$0xf] }
  0x2b   :  { %v675_v18 = vld [vmem:[#allocation5 + $0xb8] sm:$0xff]   ;;  %v677_v20 = vld [vmem:[#allocation5 + $0xb0] sm:$0xff]   ;;  %v679_v22 = vld [vmem:[#allocation5 + $0xa8] sm:$0xff]   ;;  %p758_p4 = por %p757_p3, %p756_p2 }
  0x2c   :  { %574 = vmatpush3.bf16.msra.mxu0 %v661_v3  ;;  %594 = vmatpush3.bf16.msra.mxu1 %v662_v4  ;;  %v676_v19 = vld [vmem:[#allocation5 + $0xf8] sm:$0xff]   ;;  %v678_v21 = vld [vmem:[#allocation5 + $0xf0] sm:$0xff]   ;;  %v680_v23 = vld [vmem:[#allocation5 + $0xe8] sm:$0xff]  }
  0x2d   :  { %575 = vmatprep.subr.bf16.mxu0 %v782_v0  ;;  %595 = vmatprep.subr.bf16.mxu1 %v782_v0  ;;  %v681_v24 = vld [vmem:[#allocation5 + $0xa0] sm:$0xff]   ;;  %v683_v26 = vld [vmem:[#allocation5 + $0x98] sm:$0xff]   ;;  %v685_v28 = vld [vmem:[#allocation5 + $0x90] sm:$0xff]   ;;  %p759_p5 = pnand %p758_p4, %p752_p1 }
  0x2e   :  { %v682_v25 = vld [vmem:[#allocation5 + $0xe0] sm:$0xff]   ;;  %v684_v27 = vld [vmem:[#allocation5 + $0xd8] sm:$0xff]   ;;  %v686_v29 = vld [vmem:[#allocation5 + $0xd0] sm:$0xff]  }
  0x2f   :  { %v687_v30 = vld [vmem:[#allocation5 + $0x88] sm:$0xff]   ;;  %v689_v32 = vld [vmem:[#allocation5 + $0x80] sm:$0xff]  }
  0x30   :  { %576 = vmatpush3.bf16.msra.mxu0 %v663_v5  ;;  %596 = vmatpush3.bf16.msra.mxu1 %v664_v6  ;;  %v688_v31 = vld [vmem:[#allocation5 + $0xc8] sm:$0xff]   ;;  %v690_v33 = vld [vmem:[#allocation5 + $0xc0] sm:$0xff]  }
  0x31   :  { %577 = vmatprep.subr.bf16.mxu0 %v782_v0  ;;  %597 = vmatprep.subr.bf16.mxu1 %v782_v0  ;;  %v475_v42 = vld [vmem:[#allocation7] sm:$0xf] }
  0x32   :  { %v477_v43 = vsel %vm476_vm1, %v475_v42, 0.0 }
  0x33   :  { %v478_v44 = vrot.slane %v477_v43, 4 }
  0x34   :  { %578 = vmatpush3.bf16.msra.mxu0 %v665_v7  ;;  %598 = vmatpush3.bf16.msra.mxu1 %v666_v8 }
  0x35   :  { %579 = vmatprep.subr.bf16.mxu0 %v782_v0  ;;  %599 = vmatprep.subr.bf16.mxu1 %v782_v0  ;;  %v479_v45 = vadd.f32 %v478_v44, %v477_v43 }
  0x37   :  { %v480_v46 = vrot.slane %v479_v45, 2 }
  0x38   :  { %580 = vmatpush3.bf16.msra.mxu0 %v667_v9  ;;  %600 = vmatpush3.bf16.msra.mxu1 %v668_v10 }
  0x39   :  { %581 = vmatprep.subr.bf16.mxu0 %v782_v0  ;;  %601 = vmatprep.subr.bf16.mxu1 %v782_v0  ;;  %v481_v47 = vadd.f32 %v480_v46, %v479_v45 }
  0x3b   :  { %v482_v48 = vrot.slane %v481_v47, 1 }
  0x3c   :  { %582 = vmatpush3.bf16.msra.mxu0 %v669_v11  ;;  %602 = vmatpush3.bf16.msra.mxu1 %v670_v12 }
  0x3d   :  { %583 = vmatprep.subr.bf16.mxu0 %v782_v0  ;;  %603 = vmatprep.subr.bf16.mxu1 %v782_v0  ;;  %v483_v53 = vadd.f32 %v482_v48, %v481_v47 }
  0x40   :  { %584 = vmatpush3.bf16.msra.mxu0 %v671_v13  ;;  %604 = vmatpush3.bf16.msra.mxu1 %v672_v14 }
  0x41   :  { %585 = vmatprep.subr.bf16.mxu0 %v782_v0  ;;  %605 = vmatprep.subr.bf16.mxu1 %v782_v0 }
  0x44   :  { %586 = vmatpush3.bf16.msra.mxu0 %v673_v15  ;;  %606 = vmatpush3.bf16.msra.mxu1 %v674_v16 }
  0x45   :  { %611 = vmatprep.subr.bf16.mxu0 %v782_v0  ;;  %631 = vmatprep.subr.bf16.mxu1 %v782_v0 }
  0x47   :  { %588 = vmatmul.mubr.bf16.vlgmr.msra.gmra.mxu0 %v53_v17  ;;  %608 = vmatmul.mubr.bf16.vlgmr.msra.gmra.mxu1 %v53_v17 }
  0x48   :  { %612 = vmatpush3.bf16.msra.mxu0 %v675_v18  ;;  %632 = vmatpush3.bf16.msra.mxu1 %v676_v19 }
  0x49   :  { %613 = vmatprep.subr.bf16.mxu0 %v782_v0  ;;  %633 = vmatprep.subr.bf16.mxu1 %v782_v0 }
  0x4a   :  { %627 = vmatprep.mubr.msk.bf16.mxu0 %vm783_vm0, %v782_v0  ;;  %647 = vmatprep.mubr.msk.bf16.mxu1 %vm783_vm0, %v782_v0 }
  0x4c   :  { %614 = vmatpush3.bf16.msra.mxu0 %v677_v20  ;;  %634 = vmatpush3.bf16.msra.mxu1 %v678_v21 }
  0x4d   :  { %615 = vmatprep.subr.bf16.mxu0 %v782_v0  ;;  %635 = vmatprep.subr.bf16.mxu1 %v782_v0 }
  0x50   :  { %616 = vmatpush3.bf16.msra.mxu0 %v679_v22  ;;  %636 = vmatpush3.bf16.msra.mxu1 %v680_v23 }
  0x51   :  { %617 = vmatprep.subr.bf16.mxu0 %v782_v0  ;;  %637 = vmatprep.subr.bf16.mxu1 %v782_v0 }
  0x54   :  { %618 = vmatpush3.bf16.msra.mxu0 %v681_v24  ;;  %638 = vmatpush3.bf16.msra.mxu1 %v682_v25 }
  0x55   :  { %619 = vmatprep.subr.bf16.mxu0 %v782_v0  ;;  %639 = vmatprep.subr.bf16.mxu1 %v782_v0 }
  0x58   :  { %620 = vmatpush3.bf16.msra.mxu0 %v683_v26  ;;  %640 = vmatpush3.bf16.msra.mxu1 %v684_v27 }
  0x59   :  { %621 = vmatprep.subr.bf16.mxu0 %v782_v0  ;;  %641 = vmatprep.subr.bf16.mxu1 %v782_v0 }
  0x5c   :  { %622 = vmatpush3.bf16.msra.mxu0 %v685_v28  ;;  %642 = vmatpush3.bf16.msra.mxu1 %v686_v29 }
  0x5d   :  { %623 = vmatprep.subr.bf16.mxu0 %v782_v0  ;;  %643 = vmatprep.subr.bf16.mxu1 %v782_v0 }
  0x60   :  { %624 = vmatpush3.bf16.msra.mxu0 %v687_v30  ;;  %644 = vmatpush3.bf16.msra.mxu1 %v688_v31 }
  0x61   :  { %625 = vmatprep.subr.bf16.mxu0 %v782_v0  ;;  %645 = vmatprep.subr.bf16.mxu1 %v782_v0 }
  0x64   :  { %626 = vmatpush3.bf16.msra.mxu0 %v689_v32  ;;  %646 = vmatpush3.bf16.msra.mxu1 %v690_v33 }
  0x67   :  { %628 = vmatmul.mubr.bf16.vlgmr.msra.gmra.mxu0 %v53_v17  ;;  %648 = vmatmul.mubr.bf16.vlgmr.msra.gmra.mxu1 %v53_v17 }
 0x107   :  { %v169_v34 = vpop.f32.mrf.mxu0  ;;  %v257_v35 = vpop.f32.mrf.mxu1 }
 0x108   :  { %v258_v49 = vadd.f32 %v257_v35, %v169_v34 }
 0x109   :  { %v589_v36 = vpop.f32.mrf.mxu0  ;;  %v609_v37 = vpop.f32.mrf.mxu1 }
 0x10b   :  { %v172_v38 = vpop.f32.mrf.mxu0  ;;  %v260_v39 = vpop.f32.mrf.mxu1 }
 0x10d   :  { %v590_v40 = vpop.f32.mrf.mxu0  ;;  %v610_v41 = vpop.f32.mrf.mxu1 }
 0x127   :  { %v362_v50 = vpop.f32.mrf.mxu0  ;;  %v468_v52 = vpop.f32.mrf.mxu1 }
 0x128   :  { %v368_v51 = vadd.f32 %v362_v50, %v258_v49 }
 0x129   :  { %v629_v54 = vpop.f32.mrf.mxu0  ;;  %v649_v56 = vpop.f32.mrf.mxu1 }
 0x12a   :  { %v474_v55 = vadd.f32 %v468_v52, %v368_v51 }
 0x12b   :  { %v365_v57 = vpop.f32.mrf.mxu0  ;;  %v471_v59 = vpop.f32.mrf.mxu1 }
 0x12c   :  { %v484_v58 = vadd.f32 %v483_v53, %v474_v55 }
 0x12d   :  { %v630_v60 = vpop.f32.mrf.mxu0  ;;  %v650_v62 = vpop.f32.mrf.mxu1 }
 0x12e   :  { %v485_v61 = vmul.f32 0.25, %v484_v58 }
 0x130   :  { %486 = vst [vmem:[#allocation8] sm:$0xff] %v485_v61 }
 0x131   :  { %762 = shalt.err (!%p759_p5)
}
 0x132   :  { %496 = dma.vmem_to_hbm [thread:$0]  %s494_s2, 128, %s860_s3, [#allocation4]  }
 0x133   :  { %775 = dma.done.wait [#allocation4], 128  }
 0x134   :  { %776 = vsyncadd [#allocation4], 4294967168 }
 0x135   :  { %500 = vsyncpa [#allocation3], 1 }
 0x136   :  { %501 = vsyncpa [#allocation6], 1 }
 0x137   :  { %502 = vsyncpa [#allocation4], 1 }

</bundles_post_ra>
